<compile_context>
chip_gen: v7x
topology: tpu7x:2x2x1
jax: 0.10.0
libtpu: 0.0.40
codegen_flags: <defaults>
</compile_context>

<pallas_src>
import jax
import jax.numpy as jnp
from jax.experimental import pallas as pl
from jax.experimental.pallas import tpu as pltpu

OUTPUT_DIM = 64
N_TABPFN_FEATURES = 23            # columns 1..23 of the lab values
LANES = 128                       # TPU lane width -> lane-dense slab width
TILE_BYTES = 4 * 1024 * 1024      # ~4 MiB f32 per output tile
MIN_PALLAS_ELEMS = 32768          # below this, XLA broadcast beats a Pallas launch


def _tabpfn_splat_kernel(feat_ref, w_ref, b_ref, out_ref):
    """Compute the linear surrogate regression and splat it over one tile.

    feat_ref : (23,) float32 in SMEM   -- columns 1..23 of lab_values row 0
    w_ref    : (23,) float32 in SMEM   -- surrogate regressor weights
    b_ref    : (1,)  float32 in SMEM   -- surrogate regressor bias
    out_ref  : (TB, lanes) float32 in VMEM
    """
    # ~46 scalar ops on the scalar slots; negligible next to the HBM writeback.
    pred = b_ref[0]
    for j in range(N_TABPFN_FEATURES):
        pred = pred + feat_ref[j] * w_ref[j]
    out_ref[...] = jnp.full(out_ref.shape, pred, dtype=out_ref.dtype)


def _pick_tile(rows, lane_width):
    """Choose rows-per-grid-step for an (rows, lane_width) f32 output."""
    bytes_per_row = lane_width * 4
    max_rows = max(8, (TILE_BYTES // bytes_per_row) // 8 * 8)   # ~4 MiB, 8-aligned
    if rows <= 8:
        # Single full-array block; (8, 128) divisibility is waived.
        return rows, 1
    # Split into >= 2 grid steps so the "parallel" axis can shard across
    # v7x's two TensorCores (no-op on single-TC v5e / v6e).
    tb = min(max_rows, ((pl.cdiv(rows, 2) + 7) // 8) * 8)
    return tb, pl.cdiv(rows, tb)


def _splat_call(feat, w_vec, b_vec, rows, lane_width, tb, n_steps):
    """pallas_call wrapper: scalar-in-SMEM splat over a tiled HBM writeback."""
    smem_spec = pl.BlockSpec(memory_space=pltpu.MemorySpace.SMEM)

    def call(out_spec):
        return pl.pallas_call(
            _tabpfn_splat_kernel,
            out_shape=jax.ShapeDtypeStruct((rows, lane_width), jnp.float32),
            grid=(n_steps,),
            in_specs=[smem_spec, smem_spec, smem_spec],
            out_specs=out_spec,
            compiler_params=pltpu.CompilerParams(
                dimension_semantics=("parallel",)),
        )(feat, w_vec, b_vec)

    if n_steps >= 2:
        # Triple-buffered writeback queues back-to-back output DMAs; fall back
        # to the default double-buffered spec if pipeline_mode is not honored
        # on pallas_call output specs in this build (correctness unchanged).
        try:
            return call(pl.BlockSpec((tb, lane_width), lambda i: (i, 0),
                                     pipeline_mode=pl.Buffered(3)))
        except Exception:  # graceful degrade to the validated default pipeline
            pass
    return call(pl.BlockSpec((tb, lane_width), lambda i: (i, 0)))


def tabpfn_feature_extractor(lab_values, w, b, output_dim=OUTPUT_DIM,
                             min_pallas_elems=MIN_PALLAS_ELEMS):
    """JAX wrapper mirroring TabPFNFeatureExtractor.forward."""
    lab_values = lab_values.astype(jnp.float32)
    batch_size, n_cols = lab_values.shape
    if n_cols < 1 + N_TABPFN_FEATURES:
        raise ValueError(
            f"lab_values needs >= {1 + N_TABPFN_FEATURES} columns, got {n_cols}")

    # Glue (pure indexing): unique_lab = lab[0:1]; columns 1..23 -> (23,).
    feat = jax.lax.slice(
        lab_values, (0, 1), (1, 1 + N_TABPFN_FEATURES)).reshape(N_TABPFN_FEATURES)
    w_vec = w.reshape(N_TABPFN_FEATURES).astype(jnp.float32)
    b_vec = b.reshape(1).astype(jnp.float32)

    total = batch_size * output_dim

    # Tiny outputs: Pallas launch + grid setup overhead exceeds the cost of an
    # XLA broadcast of a few KiB.
    if total <= min_pallas_elems:
        pred = jnp.sum(feat * w_vec) + b_vec[0]
        return jnp.full((batch_size, output_dim), pred, dtype=jnp.float32)

    if total % LANES == 0:
        # Lane-dense slab path: present the output as (rows, 128) so stores
        # are full-width vst; the final reshape is a contiguous row-major
        # reinterpretation (folds to a bitcast, no extra HBM copy).
        rows = total // LANES
        tb, n_steps = _pick_tile(rows, LANES)
        out_flat = _splat_call(feat, w_vec, b_vec, rows, LANES, tb, n_steps)
        return out_flat.reshape(batch_size, output_dim)

    # Odd total: write (batch_size, output_dim) directly.  Masked 64-lane
    # stores cost less than the full extra HBM copy a padded-slab trim forces.
    tb, n_steps = _pick_tile(batch_size, output_dim)
    return _splat_call(feat, w_vec, b_vec, batch_size, output_dim, tb, n_steps)


def _reference(lab_values, w, b, output_dim=OUTPUT_DIM):
    """Pure-JAX reference for correctness checking."""
    feat = lab_values[0:1, 1:1 + N_TABPFN_FEATURES].astype(jnp.float32)
    pred = jnp.sum(feat * w.astype(jnp.float32)) + b.astype(jnp.float32)[0, 0]
    return jnp.full((lab_values.shape[0], output_dim), pred, dtype=jnp.float32)


if __name__ == "__main__":
    key = jax.random.PRNGKey(0)
    k_x, k_w, k_b = jax.random.split(key, 3)

    n_cols = 24  # forward indexes columns 1..23, so >= 24 columns are required
    w = jax.random.normal(k_w, (1, N_TABPFN_FEATURES), dtype=jnp.float32) * 0.1
    b = jax.random.normal(k_b, (1, 1), dtype=jnp.float32)

    def check(batch_size, **kw):
        lab = jax.random.normal(k_x, (batch_size, n_cols), dtype=jnp.float32)
        out = jax.block_until_ready(tabpfn_feature_extractor(lab, w, b, **kw))
        ref = _reference(lab, w, b)
        assert out.shape == (batch_size, OUTPUT_DIM), out.shape
        assert jnp.allclose(out, ref, atol=1e-5, rtol=1e-5), f"mismatch (B={batch_size})"

    # Pallas kernel paths (threshold forced to 0 so small test shapes still
    # exercise the kernel):
    check(4, min_pallas_elems=0)     # even total: lane-dense slab, grid=(1,)
    check(37, min_pallas_elems=0)    # odd total: direct (B, 64) output, grid=(2,)
    check(512, min_pallas_elems=0)   # even total: 2 grid steps + buffered writeback
    # Default fast path: tiny outputs skip the Pallas launch entirely.
    check(8)

    print("KERNEL_OK")
</pallas_src>

<mosaic_0001>
module attributes {stable_mosaic.version = 11 : i64} {
  func.func @_tabpfn_splat_kernel(%arg0: i32, %arg1: memref<23xf32, #tpu.memory_space<smem>>, %arg2: memref<23xf32, #tpu.memory_space<smem>>, %arg3: memref<1xf32, #tpu.memory_space<smem>>, %arg4: memref<2x128xf32, #tpu.memory_space<vmem>>) attributes {dimension_semantics = [#tpu.dimension_semantics<parallel>], iteration_bounds = array<i64: 1>, scalar_prefetch = 0 : i64, scratch_operands = 0 : i64, tpu.core_type = #tpu.core_type<tc>, window_params = [{transform_indices = @transform_0, window_bounds = array<i64: 23>}, {transform_indices = @transform_1, window_bounds = array<i64: 23>}, {transform_indices = @transform_2, window_bounds = array<i64: 1>}, {transform_indices = @transform_3, window_bounds = array<i64: 2, 128>}]} {
    %c0 = arith.constant 0 : index
    %0 = memref.load %arg3[%c0] : memref<1xf32, #tpu.memory_space<smem>>
    %c0_0 = arith.constant 0 : index
    %1 = memref.load %arg1[%c0_0] : memref<23xf32, #tpu.memory_space<smem>>
    %c0_1 = arith.constant 0 : index
    %2 = memref.load %arg2[%c0_1] : memref<23xf32, #tpu.memory_space<smem>>
    %3 = arith.mulf %1, %2 : f32
    %4 = arith.addf %0, %3 : f32
    %c1 = arith.constant 1 : index
    %5 = memref.load %arg1[%c1] : memref<23xf32, #tpu.memory_space<smem>>
    %c1_2 = arith.constant 1 : index
    %6 = memref.load %arg2[%c1_2] : memref<23xf32, #tpu.memory_space<smem>>
    %7 = arith.mulf %5, %6 : f32
    %8 = arith.addf %4, %7 : f32
    %c2 = arith.constant 2 : index
    %9 = memref.load %arg1[%c2] : memref<23xf32, #tpu.memory_space<smem>>
    %c2_3 = arith.constant 2 : index
    %10 = memref.load %arg2[%c2_3] : memref<23xf32, #tpu.memory_space<smem>>
    %11 = arith.mulf %9, %10 : f32
    %12 = arith.addf %8, %11 : f32
    %c3 = arith.constant 3 : index
    %13 = memref.load %arg1[%c3] : memref<23xf32, #tpu.memory_space<smem>>
    %c3_4 = arith.constant 3 : index
    %14 = memref.load %arg2[%c3_4] : memref<23xf32, #tpu.memory_space<smem>>
    %15 = arith.mulf %13, %14 : f32
    %16 = arith.addf %12, %15 : f32
    %c4 = arith.constant 4 : index
    %17 = memref.load %arg1[%c4] : memref<23xf32, #tpu.memory_space<smem>>
    %c4_5 = arith.constant 4 : index
    %18 = memref.load %arg2[%c4_5] : memref<23xf32, #tpu.memory_space<smem>>
    %19 = arith.mulf %17, %18 : f32
    %20 = arith.addf %16, %19 : f32
    %c5 = arith.constant 5 : index
    %21 = memref.load %arg1[%c5] : memref<23xf32, #tpu.memory_space<smem>>
    %c5_6 = arith.constant 5 : index
    %22 = memref.load %arg2[%c5_6] : memref<23xf32, #tpu.memory_space<smem>>
    %23 = arith.mulf %21, %22 : f32
    %24 = arith.addf %20, %23 : f32
    %c6 = arith.constant 6 : index
    %25 = memref.load %arg1[%c6] : memref<23xf32, #tpu.memory_space<smem>>
    %c6_7 = arith.constant 6 : index
    %26 = memref.load %arg2[%c6_7] : memref<23xf32, #tpu.memory_space<smem>>
    %27 = arith.mulf %25, %26 : f32
    %28 = arith.addf %24, %27 : f32
    %c7 = arith.constant 7 : index
    %29 = memref.load %arg1[%c7] : memref<23xf32, #tpu.memory_space<smem>>
    %c7_8 = arith.constant 7 : index
    %30 = memref.load %arg2[%c7_8] : memref<23xf32, #tpu.memory_space<smem>>
    %31 = arith.mulf %29, %30 : f32
    %32 = arith.addf %28, %31 : f32
    %c8 = arith.constant 8 : index
    %33 = memref.load %arg1[%c8] : memref<23xf32, #tpu.memory_space<smem>>
    %c8_9 = arith.constant 8 : index
    %34 = memref.load %arg2[%c8_9] : memref<23xf32, #tpu.memory_space<smem>>
    %35 = arith.mulf %33, %34 : f32
    %36 = arith.addf %32, %35 : f32
    %c9 = arith.constant 9 : index
    %37 = memref.load %arg1[%c9] : memref<23xf32, #tpu.memory_space<smem>>
    %c9_10 = arith.constant 9 : index
    %38 = memref.load %arg2[%c9_10] : memref<23xf32, #tpu.memory_space<smem>>
    %39 = arith.mulf %37, %38 : f32
    %40 = arith.addf %36, %39 : f32
    %c10 = arith.constant 10 : index
    %41 = memref.load %arg1[%c10] : memref<23xf32, #tpu.memory_space<smem>>
    %c10_11 = arith.constant 10 : index
    %42 = memref.load %arg2[%c10_11] : memref<23xf32, #tpu.memory_space<smem>>
    %43 = arith.mulf %41, %42 : f32
    %44 = arith.addf %40, %43 : f32
    %c11 = arith.constant 11 : index
    %45 = memref.load %arg1[%c11] : memref<23xf32, #tpu.memory_space<smem>>
    %c11_12 = arith.constant 11 : index
    %46 = memref.load %arg2[%c11_12] : memref<23xf32, #tpu.memory_space<smem>>
    %47 = arith.mulf %45, %46 : f32
    %48 = arith.addf %44, %47 : f32
    %c12 = arith.constant 12 : index
    %49 = memref.load %arg1[%c12] : memref<23xf32, #tpu.memory_space<smem>>
    %c12_13 = arith.constant 12 : index
    %50 = memref.load %arg2[%c12_13] : memref<23xf32, #tpu.memory_space<smem>>
    %51 = arith.mulf %49, %50 : f32
    %52 = arith.addf %48, %51 : f32
    %c13 = arith.constant 13 : index
    %53 = memref.load %arg1[%c13] : memref<23xf32, #tpu.memory_space<smem>>
    %c13_14 = arith.constant 13 : index
    %54 = memref.load %arg2[%c13_14] : memref<23xf32, #tpu.memory_space<smem>>
    %55 = arith.mulf %53, %54 : f32
    %56 = arith.addf %52, %55 : f32
    %c14 = arith.constant 14 : index
    %57 = memref.load %arg1[%c14] : memref<23xf32, #tpu.memory_space<smem>>
    %c14_15 = arith.constant 14 : index
    %58 = memref.load %arg2[%c14_15] : memref<23xf32, #tpu.memory_space<smem>>
    %59 = arith.mulf %57, %58 : f32
    %60 = arith.addf %56, %59 : f32
    %c15 = arith.constant 15 : index
    %61 = memref.load %arg1[%c15] : memref<23xf32, #tpu.memory_space<smem>>
    %c15_16 = arith.constant 15 : index
    %62 = memref.load %arg2[%c15_16] : memref<23xf32, #tpu.memory_space<smem>>
    %63 = arith.mulf %61, %62 : f32
    %64 = arith.addf %60, %63 : f32
    %c16 = arith.constant 16 : index
    %65 = memref.load %arg1[%c16] : memref<23xf32, #tpu.memory_space<smem>>
    %c16_17 = arith.constant 16 : index
    %66 = memref.load %arg2[%c16_17] : memref<23xf32, #tpu.memory_space<smem>>
    %67 = arith.mulf %65, %66 : f32
    %68 = arith.addf %64, %67 : f32
    %c17 = arith.constant 17 : index
    %69 = memref.load %arg1[%c17] : memref<23xf32, #tpu.memory_space<smem>>
    %c17_18 = arith.constant 17 : index
    %70 = memref.load %arg2[%c17_18] : memref<23xf32, #tpu.memory_space<smem>>
    %71 = arith.mulf %69, %70 : f32
    %72 = arith.addf %68, %71 : f32
    %c18 = arith.constant 18 : index
    %73 = memref.load %arg1[%c18] : memref<23xf32, #tpu.memory_space<smem>>
    %c18_19 = arith.constant 18 : index
    %74 = memref.load %arg2[%c18_19] : memref<23xf32, #tpu.memory_space<smem>>
    %75 = arith.mulf %73, %74 : f32
    %76 = arith.addf %72, %75 : f32
    %c19 = arith.constant 19 : index
    %77 = memref.load %arg1[%c19] : memref<23xf32, #tpu.memory_space<smem>>
    %c19_20 = arith.constant 19 : index
    %78 = memref.load %arg2[%c19_20] : memref<23xf32, #tpu.memory_space<smem>>
    %79 = arith.mulf %77, %78 : f32
    %80 = arith.addf %76, %79 : f32
    %c20 = arith.constant 20 : index
    %81 = memref.load %arg1[%c20] : memref<23xf32, #tpu.memory_space<smem>>
    %c20_21 = arith.constant 20 : index
    %82 = memref.load %arg2[%c20_21] : memref<23xf32, #tpu.memory_space<smem>>
    %83 = arith.mulf %81, %82 : f32
    %84 = arith.addf %80, %83 : f32
    %c21 = arith.constant 21 : index
    %85 = memref.load %arg1[%c21] : memref<23xf32, #tpu.memory_space<smem>>
    %c21_22 = arith.constant 21 : index
    %86 = memref.load %arg2[%c21_22] : memref<23xf32, #tpu.memory_space<smem>>
    %87 = arith.mulf %85, %86 : f32
    %88 = arith.addf %84, %87 : f32
    %c22 = arith.constant 22 : index
    %89 = memref.load %arg1[%c22] : memref<23xf32, #tpu.memory_space<smem>>
    %c22_23 = arith.constant 22 : index
    %90 = memref.load %arg2[%c22_23] : memref<23xf32, #tpu.memory_space<smem>>
    %91 = arith.mulf %89, %90 : f32
    %92 = arith.addf %88, %91 : f32
    %93 = vector.broadcast %92 : f32 to vector<2x128xf32>
    %c0_24 = arith.constant 0 : index
    %c0_25 = arith.constant 0 : index
    %94 = vector.load %arg4[%c0_24, %c0_25] : memref<2x128xf32, #tpu.memory_space<vmem>>, vector<2x128xf32>
    tpu.vector_store %arg4[%c0_24, %c0_25], %93 {strides = array<i32>} : memref<2x128xf32, #tpu.memory_space<vmem>>, vector<2x128xf32>,
    return
  }
  func.func @transform_0(%arg0: i32) -> i32 {
    %c0_i32 = arith.constant 0 : i32
    %c0_i32_0 = arith.constant 0 : i32
    return %c0_i32 : i32
  }
  func.func @transform_1(%arg0: i32) -> i32 {
    %c0_i32 = arith.constant 0 : i32
    %c0_i32_0 = arith.constant 0 : i32
    return %c0_i32 : i32
  }
  func.func @transform_2(%arg0: i32) -> i32 {
    %c0_i32 = arith.constant 0 : i32
    %c0_i32_0 = arith.constant 0 : i32
    return %c0_i32 : i32
  }
  func.func @transform_3(%arg0: i32) -> (i32, i32) {
    %c0_i32 = arith.constant 0 : i32
    %c0_i32_0 = arith.constant 0 : i32
    return %arg0, %c0_i32 : i32, i32
  }
}

</mosaic_0001>

<bundles_post_ra>
// kernel: tpu_custom_call.1
= control target key start
LH: loop header
LB: loop body
LE: loop exit
PB: predicated region body
PF: predicated region fallthrough
CT: control target
= control target key end

     0   :  { %s295_s0 = inlined_call_operand.vmem [shape: f32[23], index: 0, kind: input, shape index: {}]   ;;  %s296_s1 = inlined_call_operand.vmem [shape: f32[23], index: 1, kind: input, shape index: {}]   ;;  %s297_s2 = inlined_call_operand.<no memory space> [shape: f32[1], index: 2, kind: input, shape index: {}]   ;;  %s298_s3 = inlined_call_operand.hbm [shape: f32[2,128], index: 3, kind: output, shape index: {}]  }
   0x1   :  { %300 = sst [smem:[#allocation12_spill]] %s298_s3 }
   0x2   :  { %9 = vsyncpa [#allocation5], 0 }
   0x3   :  { %10 = vsyncpa [#allocation7], 0 }
   0x4   :  { %11 = vsyncpa [#allocation4], 0  ;;  %s18_s14 = sshll.u32 %s295_s0, 4  ;;  %s28_s17 = sshll.u32 %s296_s1, 4  ;;  %s19_s14 = int_to_ptr.vmem [resolvable:$true] %s18_s14  ;;  %s29_s17 = int_to_ptr.vmem [resolvable:$true] %s28_s17 }
   0x5   :  { %s199_s18 = scalar_lea.vmem %s19_s14, 16  ;;  %p204_p1 = scmp.lt.s32.totalorder %s19_s14, %s19_s14 }
   0x6   :  { %p200_p0 = scmp.ne.s32.totalorder %s19_s14, %s199_s18  ;;  %p205_p2 = scmp.lt.s32.totalorder %s199_s18, %s199_s18 }
   0x8   :  { %p206_p3 = por %p205_p2, %p204_p1 }
   0xa   :  { %p207_p4 = pnand %p206_p3, %p200_p0 }
   0xc   :  { %210 = shalt.err (!%p207_p4)
}
   0xd   :  { %s251_s19 = smov [#allocation3]   ;;  %s211_s20 = scalar_lea.vmem %s29_s17, 16 }
   0xe   :  { %21 = dma.vmem_to_smem %s19_s14, 16, %s251_s19, [#allocation5]  }
   0xf   :  { %p212_p5 = scmp.ne.s32.totalorder %s29_s17, %s211_s20  ;;  %p216_p6 = scmp.lt.s32.totalorder %s29_s17, %s29_s17 }
  0x10   :  { %p217_p7 = scmp.lt.s32.totalorder %s211_s20, %s211_s20 }
  0x12   :  { %p218_p8 = por %p217_p7, %p216_p6 }
  0x14   :  { %p219_p9 = pnand %p218_p8, %p212_p5 }
  0x16   :  { %222 = shalt.err (!%p219_p9)
}
  0x17   :  { %s252_s0 = smov [#allocation6]  }
  0x18   :  { %31 = dma.vmem_to_smem %s29_s17, 16, %s252_s0, [#allocation7]  }
  0x19   :  { %245 = dma.done.wait [#allocation5], 16  }
  0x1a   :  { %246 = vsyncadd [#allocation5], 4294967280 }
  0x1b   :  { %247 = dma.done.wait [#allocation7], 16  }
  0x1c   :  { %248 = vsyncadd [#allocation7], 4294967280 }
  0x1d   :  { %40 = sfence }
  0x1e   :  { %s42_s1 = sld [smem:[#allocation3]]  ;;  %s152_s22 = sld [smem:[#allocation3 + $0x1]] }
  0x1f   :  { %s43_s21 = sld [smem:[#allocation6]]  ;;  %s153_s23 = sld [smem:[#allocation6 + $0x1]] }
  0x20   :  { %s154_s24 = sld [smem:[#allocation3 + $0x2]]  ;;  %s156_s26 = sld [smem:[#allocation3 + $0x3]] }
  0x21   :  { %s155_s25 = sld [smem:[#allocation6 + $0x2]]  ;;  %s157_s27 = sld [smem:[#allocation6 + $0x3]] }
  0x22   :  { %s158_s28 = sld [smem:[#allocation3 + $0x4]]  ;;  %s160_s30 = sld [smem:[#allocation3 + $0x5]] }
  0x23   :  { %s159_s29 = sld [smem:[#allocation6 + $0x4]]  ;;  %s161_s4 = sld [smem:[#allocation6 + $0x5]] }
  0x24   :  { %s162_s6 = sld [smem:[#allocation3 + $0x6]]  ;;  %s164_s14 = sld [smem:[#allocation3 + $0x7]] }
  0x25   :  { %s44_s5 = smul.f32 %s43_s21, %s42_s1  ;;  %s163_s8 = sld [smem:[#allocation6 + $0x6]] }
  0x26   :  { %s48_s7 = smul.f32 %s153_s23, %s152_s22  ;;  %s165_s18 = sld [smem:[#allocation6 + $0x7]] }
  0x27   :  { %s45_s11 = sadd.f32 %s44_s5, %s297_s2  ;;  %s52_s12 = smul.f32 %s155_s25, %s154_s24 }
  0x28   :  { %s56_s13 = smul.f32 %s157_s27, %s156_s26  ;;  %s166_s20 = sld [smem:[#allocation3 + $0x8]] }
  0x29   :  { %s49_s15 = sadd.f32 %s48_s7, %s45_s11  ;;  %s60_s16 = smul.f32 %s159_s29, %s158_s28 }
  0x2a   :  { %s64_s17 = smul.f32 %s161_s4, %s160_s30  ;;  %s167_s3 = sld [smem:[#allocation6 + $0x8]] }
  0x2b   :  { %s53_s19 = sadd.f32 %s52_s12, %s49_s15  ;;  %s68_s0 = smul.f32 %s163_s8, %s162_s6 }
  0x2c   :  { %s168_s21 = sld [smem:[#allocation3 + $0x9]]  ;;  %s170_s23 = sld [smem:[#allocation3 + $0xa]] }
  0x2d   :  { %s57_s1 = sadd.f32 %s56_s13, %s53_s19  ;;  %s169_s22 = sld [smem:[#allocation6 + $0x9]] }
  0x2e   :  { %s171_s10 = sld [smem:[#allocation6 + $0xa]]  ;;  %s72_s2 = smul.f32 %s165_s18, %s164_s14 }
  0x2f   :  { %s61_s9 = sadd.f32 %s60_s16, %s57_s1  ;;  %s172_s5 = sld [smem:[#allocation3 + $0xb]] }
  0x30   :  { %s173_s25 = sld [smem:[#allocation6 + $0xb]]  ;;  %s76_s26 = smul.f32 %s167_s3, %s166_s20 }
  0x31   :  { %s65_s24 = sadd.f32 %s64_s17, %s61_s9  ;;  %s174_s27 = sld [smem:[#allocation3 + $0xc]] }
  0x32   :  { %s175_s28 = sld [smem:[#allocation6 + $0xc]]  ;;  %s176_s30 = sld [smem:[#allocation3 + $0xd]] }
  0x33   :  { %s69_s7 = sadd.f32 %s68_s0, %s65_s24  ;;  %s80_s29 = smul.f32 %s169_s22, %s168_s21 }
  0x34   :  { %s84_s11 = smul.f32 %s171_s10, %s170_s23  ;;  %s177_s6 = sld [smem:[#allocation6 + $0xd]] }
  0x35   :  { %s73_s4 = sadd.f32 %s72_s2, %s69_s7  ;;  %s178_s8 = sld [smem:[#allocation3 + $0xe]] }
  0x36   :  { %s88_s13 = smul.f32 %s173_s25, %s172_s5  ;;  %s179_s15 = sld [smem:[#allocation6 + $0xe]] }
  0x37   :  { %s77_s12 = sadd.f32 %s76_s26, %s73_s4  ;;  %s180_s19 = sld [smem:[#allocation3 + $0xf]] }
  0x38   :  { %s92_s1 = smul.f32 %s175_s28, %s174_s27  ;;  %s181_s14 = sld [smem:[#allocation6 + $0xf]] }
  0x39   :  { %s81_s16 = sadd.f32 %s80_s29, %s77_s12  ;;  %s182_s18 = sld [smem:[#allocation3 + $0x10]] }
  0x3a   :  { %s183_s9 = sld [smem:[#allocation6 + $0x10]]  ;;  %s96_s3 = smul.f32 %s177_s6, %s176_s30 }
  0x3b   :  { %s85_s17 = sadd.f32 %s84_s11, %s81_s16  ;;  %s184_s20 = sld [smem:[#allocation3 + $0x11]] }
  0x3c   :  { %s185_s24 = sld [smem:[#allocation6 + $0x11]]  ;;  %s100_s21 = smul.f32 %s179_s15, %s178_s8 }
  0x3d   :  { %s89_s0 = sadd.f32 %s88_s13, %s85_s17  ;;  %s186_s22 = sld [smem:[#allocation3 + $0x12]] }
  0x3e   :  { %s187_s23 = sld [smem:[#allocation6 + $0x12]]  ;;  %s104_s10 = smul.f32 %s181_s14, %s180_s19 }
  0x3f   :  { %s93_s2 = sadd.f32 %s92_s1, %s89_s0  ;;  %s188_s7 = sld [smem:[#allocation3 + $0x13]] }
  0x40   :  { %s108_s5 = smul.f32 %s183_s9, %s182_s18  ;;  %s189_s25 = sld [smem:[#allocation6 + $0x13]] }
  0x41   :  { %s97_s26 = sadd.f32 %s96_s3, %s93_s2  ;;  %s190_s4 = sld [smem:[#allocation3 + $0x14]] }
  0x42   :  { %s112_s27 = smul.f32 %s185_s24, %s184_s20  ;;  %s191_s28 = sld [smem:[#allocation6 + $0x14]] }
  0x43   :  { %s101_s29 = sadd.f32 %s100_s21, %s97_s26  ;;  %s192_s12 = sld [smem:[#allocation3 + $0x15]] }
  0x44   :  { %s116_s16 = smul.f32 %s187_s23, %s186_s22  ;;  %s193_s30 = sld [smem:[#allocation6 + $0x15]] }
  0x45   :  { %s105_s11 = sadd.f32 %s104_s10, %s101_s29  ;;  %s194_s6 = sld [smem:[#allocation3 + $0x16]] }
  0x46   :  { %s195_s17 = sld [smem:[#allocation6 + $0x16]]  ;;  %s120_s15 = smul.f32 %s189_s25, %s188_s7 }
  0x47   :  { %s109_s13 = sadd.f32 %s108_s5, %s105_s11  ;;  %s253_s2 = smov [#allocation8]  }
  0x48   :  { %s124_s0 = smul.f32 %s191_s28, %s190_s4  ;;  %s142_s21 = sshll.u32 %s253_s2, 4  ;;  %s143_s21 = int_to_ptr.vmem [resolvable:$true] %s142_s21 }
  0x49   :  { %s113_s8 = sadd.f32 %s112_s27, %s109_s13  ;;  %s223_s24 = scalar_lea.vmem %s143_s21, 32 }
  0x4a   :  { %s128_s14 = smul.f32 %s193_s30, %s192_s12  ;;  %p224_p10 = scmp.ne.s32.totalorder %s143_s21, %s223_s24 }
  0x4b   :  { %s117_s1 = sadd.f32 %s116_s16, %s113_s8  ;;  %p228_p11 = scmp.lt.s32.totalorder %s143_s21, %s143_s21 }
  0x4c   :  { %s132_s18 = smul.f32 %s195_s17, %s194_s6  ;;  %p229_p12 = scmp.lt.s32.totalorder %s223_s24, %s223_s24 }
  0x4d   :  { %s121_s19 = sadd.f32 %s120_s15, %s117_s1 }
  0x4e   :  { %p230_p13 = por %p229_p12, %p228_p11 }
  0x4f   :  { %s125_s3 = sadd.f32 %s124_s0, %s121_s19 }
  0x50   :  { %p231_p0 = pnand %p230_p13, %p224_p10 }
  0x51   :  { %s129_s9 = sadd.f32 %s128_s14, %s125_s3 }
  0x53   :  { %s133_s20 = sadd.f32 %s132_s18, %s129_s9 }
  0x55   :  { %v134_v0 = vstv %s133_s20 }
  0x56   :  { %135 = vst [vmem:[#allocation8] sm:$0x3] %v134_v0 }
  0x57   :  { %234 = shalt.err (!%p231_p0)
}
  0x58   :  { %s301_s10 = sld [smem:[#allocation12_spill]] }
  0x5e   :  { %s235_s7 = scalar_lea.hbm %s301_s10, 32 }
  0x5f   :  { %p236_p1 = scmp.ne.s32.totalorder %s301_s10, %s235_s7  ;;  %p239_p2 = scmp.lt.u32.totalorder %s235_s7, %s301_s10 }
  0x61   :  { %p241_p3 = pnand %p239_p2, %p236_p1 }
  0x63   :  { %244 = shalt.err (!%p241_p3)
}
  0x64   :  { %145 = dma.vmem_to_hbm [thread:$0]  %s143_s21, 32, %s301_s10, [#allocation4]  }
  0x65   :  { %249 = dma.done.wait [#allocation4], 32  }
  0x66   :  { %250 = vsyncadd [#allocation4], 4294967264 }
  0x67   :  { %149 = vsyncpa [#allocation4], 1 }
  0x68   :  { %150 = vsyncpa [#allocation5], 1 }
  0x69   :  { %151 = vsyncpa [#allocation7], 1 }

</bundles_post_ra>
